<compile_context>
chip_gen: v6e
topology: v6e:2x2x1
jax: 0.10.0
libtpu: 0.0.40
codegen_flags: <defaults>
</compile_context>

<pallas_src>
import jax
import jax.numpy as jnp
from jax.experimental import pallas as pl
from jax.experimental.pallas import tpu as pltpu


def _round_up(n, m):
    return ((n + m - 1) // m) * m


def _pick_time_chunk(T, B, I, Hp, O, max_time_chunk=512, vmem_budget_bytes=4 << 20):
    """Time-chunk length (multiple of 8) sized from a VMEM budget, plus chunk count."""
    # per-timestep VMEM cost: double-buffered x/seq/y blocks + xp scratch (f32, rough)
    bytes_per_t = 4 * B * (2 * (I + Hp + O) + Hp)
    cap = min(int(max_time_chunk), max(8, vmem_budget_bytes // bytes_per_t))
    cap = max(8, (cap // 8) * 8)
    n_chunks = -(-T // cap)                 # ceil
    tc = -(-T // n_chunks)                  # balanced chunks
    tc = ((tc + 7) // 8) * 8                # multiple of 8 -> sublane-dense blocks
    return tc, n_chunks


def _rnn_fused_kernel(x_ref, wih_ref, whh_ref, wout_ref, h0_ref,
                      seq_ref, y_ref, h_sc, xp_sc):
    """One grid step == one time chunk of the recurrence, with fused in/out projections.

    x_ref   : (B, Tc, I)   raw input chunk
    wih_ref : (I, Hp)      W_ih^T   (resident, compute dtype)
    whh_ref : (Hp, Hp)     W_hh^T   (resident, compute dtype)
    wout_ref: (Hp, O)      W_out^T  (resident, compute dtype)
    h0_ref  : (B, Hp)      initial hidden state (f32, resident)
    seq_ref : (B, Tc, Hp)  hidden-state chunk (f32 out)
    y_ref   : (B, Tc, O)   output chunk (f32 out)
    h_sc    : (B, Hp) f32  carried hidden state (persists across grid steps)
    xp_sc   : (B, Tc, Hp)  f32 chunk input projection
    """
    B, Tc, _ = x_ref.shape
    Hp = whh_ref.shape[0]
    cdt = whh_ref.dtype                      # compute dtype (bf16 on the hot path)

    # Load the initial hidden state into the carried scratch on the first chunk.
    @pl.when(pl.program_id(0) == 0)
    def _():
        h_sc[...] = h0_ref[...]

    # ---- fused input projection for the whole chunk (no sequential dependence):
    #      one (Tc, I) x (I, Hp) matmul per batch plane (B is tiny and static).
    wih = wih_ref[...]
    for b in range(B):
        xp_sc[b] = jnp.dot(x_ref[b].astype(cdt), wih,
                           preferred_element_type=jnp.float32)

    whh = whh_ref[...]                       # resident across the chunk

    # ---- the inherently serial part:  h_t = tanh(xp_t + h_{t-1} @ W_hh^T)
    def step(k, h):
        xk = xp_sc[:, pl.ds(k, 1), :].reshape(B, Hp)
        pre = xk + jnp.dot(h.astype(cdt), whh, preferred_element_type=jnp.float32)
        h_new = jnp.tanh(pre)                # f32 carry
        seq_ref[:, pl.ds(k, 1), :] = h_new.reshape(B, 1, Hp).astype(seq_ref.dtype)
        return h_new

    h_final = jax.lax.fori_loop(0, Tc, step, h_sc[...], unroll=min(int(Tc), 8))
    h_sc[...] = h_final

    # ---- fused output Linear on the chunk that is already resident in VMEM.
    wout = wout_ref[...]
    for b in range(B):
        y_ref[b] = jnp.dot(seq_ref[b].astype(cdt), wout,
                           preferred_element_type=jnp.float32).astype(y_ref.dtype)


def rnn_model_forward(x, initial_states_s0, params, compute_dtype=jnp.bfloat16,
                      max_time_chunk=512):
    """
    x                 : (B, T, I)  float32, batch_first (PyTorch convention)
    initial_states_s0 : (num_layers=1, B, H)  float32
    params            : w_ih (H, I), w_hh (H, H), w_out (O, H)   (bias=False everywhere)
    Returns (sequence_of_states (B,T,H), output_sequence (B,T,O), hstate_at_T (1,B,H)).
    """
    B, T, I = x.shape
    L = initial_states_s0.shape[0]
    assert L == 1, "single-layer RNN only (module default num_layers=1)"
    H = params["w_hh"].shape[0]
    O = params["w_out"].shape[0]

    Hp = _round_up(H, 128)                               # lane-dense hidden width
    Tc, n_chunks = _pick_time_chunk(T, B, I, Hp, O, max_time_chunk=max_time_chunk)
    Tp = Tc * n_chunks                                   # padded sequence length

    # Zero-pad time (exact: padded steps are computed then sliced away) and hidden lanes
    # (exact: padded lanes stay identically 0 through the tanh recurrence).
    x_pad = jnp.pad(x, ((0, 0), (0, Tp - T), (0, 0)))
    wih_t = jnp.pad(params["w_ih"].T.astype(compute_dtype), ((0, 0), (0, Hp - H)))
    whh_t = jnp.pad(params["w_hh"].T.astype(compute_dtype), ((0, Hp - H), (0, Hp - H)))
    wout_t = jnp.pad(params["w_out"].T.astype(compute_dtype), ((0, Hp - H), (0, 0)))
    h0 = jnp.pad(initial_states_s0[0].astype(jnp.float32), ((0, 0), (0, Hp - H)))

    seq_pad, y_pad = pl.pallas_call(
        _rnn_fused_kernel,
        out_shape=(
            jax.ShapeDtypeStruct((B, Tp, Hp), jnp.float32),   # sequence_of_states (padded)
            jax.ShapeDtypeStruct((B, Tp, O), jnp.float32),    # output_sequence   (padded)
        ),
        grid_spec=pltpu.PrefetchScalarGridSpec(
            num_scalar_prefetch=0,
            grid=(n_chunks,),
            in_specs=[
                pl.BlockSpec((B, Tc, I), lambda c: (0, c, 0)),   # raw x chunk
                pl.BlockSpec((I, Hp), lambda c: (0, 0)),         # W_ih^T  (resident)
                pl.BlockSpec((Hp, Hp), lambda c: (0, 0)),        # W_hh^T  (resident)
                pl.BlockSpec((Hp, O), lambda c: (0, 0)),         # W_out^T (resident)
                pl.BlockSpec((B, Hp), lambda c: (0, 0)),         # h0      (resident)
            ],
            out_specs=[
                pl.BlockSpec((B, Tc, Hp), lambda c: (0, c, 0)),  # hidden states
                pl.BlockSpec((B, Tc, O), lambda c: (0, c, 0)),   # outputs
            ],
            scratch_shapes=[
                pltpu.VMEM((B, Hp), jnp.float32),                # carried hidden state
                pltpu.VMEM((B, Tc, Hp), jnp.float32),            # chunk input projection
            ],
        ),
        compiler_params=pltpu.CompilerParams(
            dimension_semantics=("arbitrary",),                  # time is sequential
            vmem_limit_bytes=32 * 1024 * 1024,
        ),
    )(x_pad, wih_t, whh_t, wout_t, h0)

    seq = seq_pad[:, :T, :H]                                     # (B, T, H)
    y = y_pad[:, :T, :]                                          # (B, T, O)
    hT = seq[:, T - 1, :][None]                                  # (1, B, H) == h at time T
    return seq, y, hT


def init_params(key, input_size, hidden_size, output_size):
    """Deterministic init matching the PyTorch parameter shapes (nn.RNN/Linear, bias=False)."""
    k = jax.random.split(key, 3)
    s = 1.0 / jnp.sqrt(hidden_size)
    u = lambda kk, shape: jax.random.uniform(kk, shape, jnp.float32, minval=-s, maxval=s)
    return {
        "w_ih": u(k[0], (hidden_size, input_size)),
        "w_hh": u(k[1], (hidden_size, hidden_size)),
        "w_out": u(k[2], (output_size, hidden_size)),
    }


def initial_hidden_state(key, num_layers, batch_size, hidden_size, s0_nature="random_"):
    if s0_nature.lower() == "zeros_":
        return jnp.zeros((num_layers, batch_size, hidden_size), jnp.float32)
    elif s0_nature.lower() == "random_":
        return jax.random.uniform(key, (num_layers, batch_size, hidden_size),
                                  jnp.float32, minval=-0.75, maxval=0.75)
    else:
        raise ValueError("s0_nature must be either 'zeros_' or 'random_'")


def _reference_forward(x, s0, params):
    """Pure-JAX reference (lax.scan) matching the PyTorch RNNModel forward."""
    def step(h, x_t):
        h_new = jnp.tanh(x_t @ params["w_ih"].T + h @ params["w_hh"].T)
        return h_new, h_new

    hT, seq_tm = jax.lax.scan(step, s0[0], jnp.transpose(x, (1, 0, 2)))
    seq = jnp.transpose(seq_tm, (1, 0, 2))
    y = seq @ params["w_out"].T
    return seq, y, hT[None]


if __name__ == "__main__":
    B, T, I, H, O = 2, 8, 4, 32, 3
    num_layers = 1  # kernel implements the single-layer case (module default)

    key = jax.random.PRNGKey(0)
    kx, kp, ks, kx2 = jax.random.split(key, 4)

    x = jax.random.normal(kx, (B, T, I), jnp.float32)
    params = init_params(kp, I, H, O)
    s0 = initial_hidden_state(ks, num_layers, B, H, s0_nature="random_")

    seq_r, y_r, hT_r = _reference_forward(x, s0, params)

    # f32 matmul path: tight numerical check against the reference.
    seq, y, hT = rnn_model_forward(x, s0, params, compute_dtype=jnp.float32)
    jax.block_until_ready((seq, y, hT))
    assert seq.shape == (B, T, H) and y.shape == (B, T, O)
    assert hT.shape == (num_layers, B, H)
    assert jnp.allclose(seq, seq_r, atol=1e-5)
    assert jnp.allclose(y, y_r, atol=1e-5)
    assert jnp.allclose(hT, hT_r, atol=1e-5)

    # Default hot path: bf16 weights on the MXU, f32 carry/accum -> wider tolerance.
    seq_b, y_b, hT_b = rnn_model_forward(x, s0, params)
    jax.block_until_ready((seq_b, y_b, hT_b))
    assert jnp.allclose(seq_b, seq_r, atol=5e-2)
    assert jnp.allclose(y_b, y_r, atol=5e-2)
    assert jnp.allclose(hT_b, hT_r, atol=5e-2)

    # Odd sequence length + multi-chunk grid (exercises time padding & chunk-to-chunk carry).
    T2 = 13
    x2 = jax.random.normal(kx2, (B, T2, I), jnp.float32)
    seq2_r, y2_r, hT2_r = _reference_forward(x2, s0, params)
    seq2, y2, hT2 = rnn_model_forward(x2, s0, params, compute_dtype=jnp.float32,
                                      max_time_chunk=8)
    jax.block_until_ready((seq2, y2, hT2))
    assert seq2.shape == (B, T2, H) and y2.shape == (B, T2, O)
    assert jnp.allclose(seq2, seq2_r, atol=1e-5)
    assert jnp.allclose(y2, y2_r, atol=1e-5)
    assert jnp.allclose(hT2, hT2_r, atol=1e-5)

    print("KERNEL_OK")
</pallas_src>

<mosaic_0001>
module attributes {stable_mosaic.version = 11 : i64} {
  func.func @_rnn_fused_kernel(%arg0: i32, %arg1: memref<2x8x4xf32, #tpu.memory_space<vmem>>, %arg2: memref<4x128xf32, #tpu.memory_space<vmem>>, %arg3: memref<128x128xf32, #tpu.memory_space<vmem>>, %arg4: memref<128x3xf32, #tpu.memory_space<vmem>>, %arg5: memref<2x128xf32, #tpu.memory_space<vmem>>, %arg6: memref<2x8x128xf32, #tpu.memory_space<vmem>>, %arg7: memref<2x8x3xf32, #tpu.memory_space<vmem>>, %arg8: memref<2x128xf32, #tpu.memory_space<vmem>>, %arg9: memref<2x8x128xf32, #tpu.memory_space<vmem>>) attributes {dimension_semantics = [#tpu.dimension_semantics<arbitrary>], iteration_bounds = array<i64: 1>, scalar_prefetch = 0 : i64, scratch_operands = 2 : i64, tpu.core_type = #tpu.core_type<tc>, window_params = [{transform_indices = @transform_0, window_bounds = array<i64: 2, 8, 4>}, {pipeline_mode = #tpu.pipeline_mode<synchronous>, transform_indices = @transform_1, window_bounds = array<i64: 4, 128>}, {pipeline_mode = #tpu.pipeline_mode<synchronous>, transform_indices = @transform_2, window_bounds = array<i64: 128, 128>}, {pipeline_mode = #tpu.pipeline_mode<synchronous>, transform_indices = @transform_3, window_bounds = array<i64: 128, 3>}, {pipeline_mode = #tpu.pipeline_mode<synchronous>, transform_indices = @transform_4, window_bounds = array<i64: 2, 128>}, {transform_indices = @transform_5, window_bounds = array<i64: 2, 8, 128>}, {transform_indices = @transform_6, window_bounds = array<i64: 2, 8, 3>}]} {
    %c0_i32 = arith.constant 0 : i32
    %0 = arith.cmpi eq, %arg0, %c0_i32 : i32
    %1 = arith.extui %0 : i1 to i32
    %c0_i32_0 = arith.constant 0 : i32
    %2 = arith.cmpi ne, %1, %c0_i32_0 : i32
    scf.if %2 {
      %c0_77 = arith.constant 0 : index
      %c0_78 = arith.constant 0 : index
      %104 = vector.load %arg5[%c0_77, %c0_78] : memref<2x128xf32, #tpu.memory_space<vmem>>, vector<2x128xf32>
      %c0_79 = arith.constant 0 : index
      %c0_80 = arith.constant 0 : index
      %105 = vector.load %arg8[%c0_79, %c0_80] : memref<2x128xf32, #tpu.memory_space<vmem>>, vector<2x128xf32>
      tpu.vector_store %arg8[%c0_79, %c0_80], %104 {strides = array<i32>} : memref<2x128xf32, #tpu.memory_space<vmem>>, vector<2x128xf32>,
    } else {
    }
    %c0 = arith.constant 0 : index
    %c0_1 = arith.constant 0 : index
    %3 = vector.load %arg2[%c0, %c0_1] : memref<4x128xf32, #tpu.memory_space<vmem>>, vector<4x128xf32>
    %c0_2 = arith.constant 0 : index
    %c0_3 = arith.constant 0 : index
    %c0_4 = arith.constant 0 : index
    %4 = vector.load %arg1[%c0_2, %c0_3, %c0_4] : memref<2x8x4xf32, #tpu.memory_space<vmem>>, vector<1x8x4xf32>
    %5 = vector.shape_cast %4 : vector<1x8x4xf32> to vector<8x4xf32>
    %cst = arith.constant dense<0.000000e+00> : vector<8x128xf32>
    %6 = tpu.matmul %5, %3, %cst {dimension_numbers = #tpu.dot_dimension_numbers<[1], [0], [0], [1], [0, 0, 1, 1], [], []>} : vector<8x4xf32>, vector<4x128xf32>, vector<8x128xf32> -> vector<8x128xf32>
    %c0_5 = arith.constant 0 : index
    %c0_6 = arith.constant 0 : index
    %c0_7 = arith.constant 0 : index
    %7 = vector.load %arg9[%c0_5, %c0_6, %c0_7] : memref<2x8x128xf32, #tpu.memory_space<vmem>>, vector<1x8x128xf32>
    %8 = vector.shape_cast %7 : vector<1x8x128xf32> to vector<8x128xf32>
    %9 = vector.shape_cast %6 : vector<8x128xf32> to vector<1x8x128xf32>
    tpu.vector_store %arg9[%c0_5, %c0_6, %c0_7], %9 {strides = array<i32>} : memref<2x8x128xf32, #tpu.memory_space<vmem>>, vector<1x8x128xf32>,
    %c1 = arith.constant 1 : index
    %c0_8 = arith.constant 0 : index
    %c0_9 = arith.constant 0 : index
    %10 = vector.load %arg1[%c1, %c0_8, %c0_9] : memref<2x8x4xf32, #tpu.memory_space<vmem>>, vector<1x8x4xf32>
    %11 = vector.shape_cast %10 : vector<1x8x4xf32> to vector<8x4xf32>
    %cst_10 = arith.constant dense<0.000000e+00> : vector<8x128xf32>
    %12 = tpu.matmul %11, %3, %cst_10 {dimension_numbers = #tpu.dot_dimension_numbers<[1], [0], [0], [1], [0, 0, 1, 1], [], []>} : vector<8x4xf32>, vector<4x128xf32>, vector<8x128xf32> -> vector<8x128xf32>
    %c1_11 = arith.constant 1 : index
    %c0_12 = arith.constant 0 : index
    %c0_13 = arith.constant 0 : index
    %13 = vector.load %arg9[%c1_11, %c0_12, %c0_13] : memref<2x8x128xf32, #tpu.memory_space<vmem>>, vector<1x8x128xf32>
    %14 = vector.shape_cast %13 : vector<1x8x128xf32> to vector<8x128xf32>
    %15 = vector.shape_cast %12 : vector<8x128xf32> to vector<1x8x128xf32>
    tpu.vector_store %arg9[%c1_11, %c0_12, %c0_13], %15 {strides = array<i32>} : memref<2x8x128xf32, #tpu.memory_space<vmem>>, vector<1x8x128xf32>,
    %c0_14 = arith.constant 0 : index
    %c0_15 = arith.constant 0 : index
    %16 = vector.load %arg3[%c0_14, %c0_15] : memref<128x128xf32, #tpu.memory_space<vmem>>, vector<128x128xf32>
    %c0_16 = arith.constant 0 : index
    %c0_17 = arith.constant 0 : index
    %17 = vector.load %arg8[%c0_16, %c0_17] : memref<2x128xf32, #tpu.memory_space<vmem>>, vector<2x128xf32>
    %c0_i32_18 = arith.constant 0 : i32
    %c0_19 = arith.constant 0 : index
    %18 = arith.index_cast %c0_i32_18 : i32 to index
    %c0_20 = arith.constant 0 : index
    %19 = vector.load %arg9[%c0_19, %18, %c0_20] : memref<2x8x128xf32, #tpu.memory_space<vmem>>, vector<2x1x128xf32>
    %20 = vector.shape_cast %19 : vector<2x1x128xf32> to vector<2x128xf32>
    %cst_21 = arith.constant dense<0.000000e+00> : vector<2x128xf32>
    %21 = tpu.matmul %17, %16, %cst_21 {dimension_numbers = #tpu.dot_dimension_numbers<[1], [0], [0], [1], [0, 0, 1, 1], [], []>} : vector<2x128xf32>, vector<128x128xf32>, vector<2x128xf32> -> vector<2x128xf32>
    %22 = arith.addf %20, %21 : vector<2x128xf32>
    %23 = math.tanh %22 : vector<2x128xf32>
    %24 = vector.shape_cast %23 : vector<2x128xf32> to vector<2x1x128xf32>
    %c0_22 = arith.constant 0 : index
    %25 = arith.index_cast %c0_i32_18 : i32 to index
    %c0_23 = arith.constant 0 : index
    %26 = vector.load %arg6[%c0_22, %25, %c0_23] : memref<2x8x128xf32, #tpu.memory_space<vmem>>, vector<2x1x128xf32>
    tpu.vector_store %arg6[%c0_22, %25, %c0_23], %24 {strides = array<i32>} : memref<2x8x128xf32, #tpu.memory_space<vmem>>, vector<2x1x128xf32>,
    %c1_i32 = arith.constant 1 : i32
    %c0_24 = arith.constant 0 : index
    %27 = arith.index_cast %c1_i32 : i32 to index
    %c0_25 = arith.constant 0 : index
    %28 = vector.load %arg9[%c0_24, %27, %c0_25] : memref<2x8x128xf32, #tpu.memory_space<vmem>>, vector<2x1x128xf32>
    %29 = vector.shape_cast %28 : vector<2x1x128xf32> to vector<2x128xf32>
    %cst_26 = arith.constant dense<0.000000e+00> : vector<2x128xf32>
    %30 = tpu.matmul %23, %16, %cst_26 {dimension_numbers = #tpu.dot_dimension_numbers<[1], [0], [0], [1], [0, 0, 1, 1], [], []>} : vector<2x128xf32>, vector<128x128xf32>, vector<2x128xf32> -> vector<2x128xf32>
    %31 = arith.addf %29, %30 : vector<2x128xf32>
    %32 = math.tanh %31 : vector<2x128xf32>
    %33 = vector.shape_cast %32 : vector<2x128xf32> to vector<2x1x128xf32>
    %c0_27 = arith.constant 0 : index
    %34 = arith.index_cast %c1_i32 : i32 to index
    %c0_28 = arith.constant 0 : index
    %35 = vector.load %arg6[%c0_27, %34, %c0_28] : memref<2x8x128xf32, #tpu.memory_space<vmem>>, vector<2x1x128xf32>
    tpu.vector_store %arg6[%c0_27, %34, %c0_28], %33 {strides = array<i32>} : memref<2x8x128xf32, #tpu.memory_space<vmem>>, vector<2x1x128xf32>,
    %c2_i32 = arith.constant 2 : i32
    %c0_29 = arith.constant 0 : index
    %36 = arith.index_cast %c2_i32 : i32 to index
    %c0_30 = arith.constant 0 : index
    %37 = vector.load %arg9[%c0_29, %36, %c0_30] : memref<2x8x128xf32, #tpu.memory_space<vmem>>, vector<2x1x128xf32>
    %38 = vector.shape_cast %37 : vector<2x1x128xf32> to vector<2x128xf32>
    %cst_31 = arith.constant dense<0.000000e+00> : vector<2x128xf32>
    %39 = tpu.matmul %32, %16, %cst_31 {dimension_numbers = #tpu.dot_dimension_numbers<[1], [0], [0], [1], [0, 0, 1, 1], [], []>} : vector<2x128xf32>, vector<128x128xf32>, vector<2x128xf32> -> vector<2x128xf32>
    %40 = arith.addf %38, %39 : vector<2x128xf32>
    %41 = math.tanh %40 : vector<2x128xf32>
    %42 = vector.shape_cast %41 : vector<2x128xf32> to vector<2x1x128xf32>
    %c0_32 = arith.constant 0 : index
    %43 = arith.index_cast %c2_i32 : i32 to index
    %c0_33 = arith.constant 0 : index
    %44 = vector.load %arg6[%c0_32, %43, %c0_33] : memref<2x8x128xf32, #tpu.memory_space<vmem>>, vector<2x1x128xf32>
    tpu.vector_store %arg6[%c0_32, %43, %c0_33], %42 {strides = array<i32>} : memref<2x8x128xf32, #tpu.memory_space<vmem>>, vector<2x1x128xf32>,
    %c3_i32 = arith.constant 3 : i32
    %c0_34 = arith.constant 0 : index
    %45 = arith.index_cast %c3_i32 : i32 to index
    %c0_35 = arith.constant 0 : index
    %46 = vector.load %arg9[%c0_34, %45, %c0_35] : memref<2x8x128xf32, #tpu.memory_space<vmem>>, vector<2x1x128xf32>
    %47 = vector.shape_cast %46 : vector<2x1x128xf32> to vector<2x128xf32>
    %cst_36 = arith.constant dense<0.000000e+00> : vector<2x128xf32>
    %48 = tpu.matmul %41, %16, %cst_36 {dimension_numbers = #tpu.dot_dimension_numbers<[1], [0], [0], [1], [0, 0, 1, 1], [], []>} : vector<2x128xf32>, vector<128x128xf32>, vector<2x128xf32> -> vector<2x128xf32>
    %49 = arith.addf %47, %48 : vector<2x128xf32>
    %50 = math.tanh %49 : vector<2x128xf32>
    %51 = vector.shape_cast %50 : vector<2x128xf32> to vector<2x1x128xf32>
    %c0_37 = arith.constant 0 : index
    %52 = arith.index_cast %c3_i32 : i32 to index
    %c0_38 = arith.constant 0 : index
    %53 = vector.load %arg6[%c0_37, %52, %c0_38] : memref<2x8x128xf32, #tpu.memory_space<vmem>>, vector<2x1x128xf32>
    tpu.vector_store %arg6[%c0_37, %52, %c0_38], %51 {strides = array<i32>} : memref<2x8x128xf32, #tpu.memory_space<vmem>>, vector<2x1x128xf32>,
    %c4_i32 = arith.constant 4 : i32
    %c0_39 = arith.constant 0 : index
    %54 = arith.index_cast %c4_i32 : i32 to index
    %c0_40 = arith.constant 0 : index
    %55 = vector.load %arg9[%c0_39, %54, %c0_40] : memref<2x8x128xf32, #tpu.memory_space<vmem>>, vector<2x1x128xf32>
    %56 = vector.shape_cast %55 : vector<2x1x128xf32> to vector<2x128xf32>
    %cst_41 = arith.constant dense<0.000000e+00> : vector<2x128xf32>
    %57 = tpu.matmul %50, %16, %cst_41 {dimension_numbers = #tpu.dot_dimension_numbers<[1], [0], [0], [1], [0, 0, 1, 1], [], []>} : vector<2x128xf32>, vector<128x128xf32>, vector<2x128xf32> -> vector<2x128xf32>
    %58 = arith.addf %56, %57 : vector<2x128xf32>
    %59 = math.tanh %58 : vector<2x128xf32>
    %60 = vector.shape_cast %59 : vector<2x128xf32> to vector<2x1x128xf32>
    %c0_42 = arith.constant 0 : index
    %61 = arith.index_cast %c4_i32 : i32 to index
    %c0_43 = arith.constant 0 : index
    %62 = vector.load %arg6[%c0_42, %61, %c0_43] : memref<2x8x128xf32, #tpu.memory_space<vmem>>, vector<2x1x128xf32>
    tpu.vector_store %arg6[%c0_42, %61, %c0_43], %60 {strides = array<i32>} : memref<2x8x128xf32, #tpu.memory_space<vmem>>, vector<2x1x128xf32>,
    %c5_i32 = arith.constant 5 : i32
    %c0_44 = arith.constant 0 : index
    %63 = arith.index_cast %c5_i32 : i32 to index
    %c0_45 = arith.constant 0 : index
    %64 = vector.load %arg9[%c0_44, %63, %c0_45] : memref<2x8x128xf32, #tpu.memory_space<vmem>>, vector<2x1x128xf32>
    %65 = vector.shape_cast %64 : vector<2x1x128xf32> to vector<2x128xf32>
    %cst_46 = arith.constant dense<0.000000e+00> : vector<2x128xf32>
    %66 = tpu.matmul %59, %16, %cst_46 {dimension_numbers = #tpu.dot_dimension_numbers<[1], [0], [0], [1], [0, 0, 1, 1], [], []>} : vector<2x128xf32>, vector<128x128xf32>, vector<2x128xf32> -> vector<2x128xf32>
    %67 = arith.addf %65, %66 : vector<2x128xf32>
    %68 = math.tanh %67 : vector<2x128xf32>
    %69 = vector.shape_cast %68 : vector<2x128xf32> to vector<2x1x128xf32>
    %c0_47 = arith.constant 0 : index
    %70 = arith.index_cast %c5_i32 : i32 to index
    %c0_48 = arith.constant 0 : index
    %71 = vector.load %arg6[%c0_47, %70, %c0_48] : memref<2x8x128xf32, #tpu.memory_space<vmem>>, vector<2x1x128xf32>
    tpu.vector_store %arg6[%c0_47, %70, %c0_48], %69 {strides = array<i32>} : memref<2x8x128xf32, #tpu.memory_space<vmem>>, vector<2x1x128xf32>,
    %c6_i32 = arith.constant 6 : i32
    %c0_49 = arith.constant 0 : index
    %72 = arith.index_cast %c6_i32 : i32 to index
    %c0_50 = arith.constant 0 : index
    %73 = vector.load %arg9[%c0_49, %72, %c0_50] : memref<2x8x128xf32, #tpu.memory_space<vmem>>, vector<2x1x128xf32>
    %74 = vector.shape_cast %73 : vector<2x1x128xf32> to vector<2x128xf32>
    %cst_51 = arith.constant dense<0.000000e+00> : vector<2x128xf32>
    %75 = tpu.matmul %68, %16, %cst_51 {dimension_numbers = #tpu.dot_dimension_numbers<[1], [0], [0], [1], [0, 0, 1, 1], [], []>} : vector<2x128xf32>, vector<128x128xf32>, vector<2x128xf32> -> vector<2x128xf32>
    %76 = arith.addf %74, %75 : vector<2x128xf32>
    %77 = math.tanh %76 : vector<2x128xf32>
    %78 = vector.shape_cast %77 : vector<2x128xf32> to vector<2x1x128xf32>
    %c0_52 = arith.constant 0 : index
    %79 = arith.index_cast %c6_i32 : i32 to index
    %c0_53 = arith.constant 0 : index
    %80 = vector.load %arg6[%c0_52, %79, %c0_53] : memref<2x8x128xf32, #tpu.memory_space<vmem>>, vector<2x1x128xf32>
    tpu.vector_store %arg6[%c0_52, %79, %c0_53], %78 {strides = array<i32>} : memref<2x8x128xf32, #tpu.memory_space<vmem>>, vector<2x1x128xf32>,
    %c7_i32 = arith.constant 7 : i32
    %c0_54 = arith.constant 0 : index
    %81 = arith.index_cast %c7_i32 : i32 to index
    %c0_55 = arith.constant 0 : index
    %82 = vector.load %arg9[%c0_54, %81, %c0_55] : memref<2x8x128xf32, #tpu.memory_space<vmem>>, vector<2x1x128xf32>
    %83 = vector.shape_cast %82 : vector<2x1x128xf32> to vector<2x128xf32>
    %cst_56 = arith.constant dense<0.000000e+00> : vector<2x128xf32>
    %84 = tpu.matmul %77, %16, %cst_56 {dimension_numbers = #tpu.dot_dimension_numbers<[1], [0], [0], [1], [0, 0, 1, 1], [], []>} : vector<2x128xf32>, vector<128x128xf32>, vector<2x128xf32> -> vector<2x128xf32>
    %85 = arith.addf %83, %84 : vector<2x128xf32>
    %86 = math.tanh %85 : vector<2x128xf32>
    %87 = vector.shape_cast %86 : vector<2x128xf32> to vector<2x1x128xf32>
    %c0_57 = arith.constant 0 : index
    %88 = arith.index_cast %c7_i32 : i32 to index
    %c0_58 = arith.constant 0 : index
    %89 = vector.load %arg6[%c0_57, %88, %c0_58] : memref<2x8x128xf32, #tpu.memory_space<vmem>>, vector<2x1x128xf32>
    tpu.vector_store %arg6[%c0_57, %88, %c0_58], %87 {strides = array<i32>} : memref<2x8x128xf32, #tpu.memory_space<vmem>>, vector<2x1x128xf32>,
    %c8_i32 = arith.constant 8 : i32
    %c0_59 = arith.constant 0 : index
    %c0_60 = arith.constant 0 : index
    %90 = vector.load %arg8[%c0_59, %c0_60] : memref<2x128xf32, #tpu.memory_space<vmem>>, vector<2x128xf32>
    tpu.vector_store %arg8[%c0_59, %c0_60], %86 {strides = array<i32>} : memref<2x128xf32, #tpu.memory_space<vmem>>, vector<2x128xf32>,
    %c0_61 = arith.constant 0 : index
    %c0_62 = arith.constant 0 : index
    %91 = vector.load %arg4[%c0_61, %c0_62] : memref<128x3xf32, #tpu.memory_space<vmem>>, vector<128x3xf32>
    %c0_63 = arith.constant 0 : index
    %c0_64 = arith.constant 0 : index
    %c0_65 = arith.constant 0 : index
    %92 = vector.load %arg6[%c0_63, %c0_64, %c0_65] : memref<2x8x128xf32, #tpu.memory_space<vmem>>, vector<1x8x128xf32>
    %93 = vector.shape_cast %92 : vector<1x8x128xf32> to vector<8x128xf32>
    %cst_66 = arith.constant dense<0.000000e+00> : vector<8x3xf32>
    %94 = tpu.matmul %93, %91, %cst_66 {dimension_numbers = #tpu.dot_dimension_numbers<[1], [0], [0], [1], [0, 0, 1, 1], [], []>} : vector<8x128xf32>, vector<128x3xf32>, vector<8x3xf32> -> vector<8x3xf32>
    %c0_67 = arith.constant 0 : index
    %c0_68 = arith.constant 0 : index
    %c0_69 = arith.constant 0 : index
    %95 = vector.load %arg7[%c0_67, %c0_68, %c0_69] : memref<2x8x3xf32, #tpu.memory_space<vmem>>, vector<1x8x3xf32>
    %96 = vector.shape_cast %95 : vector<1x8x3xf32> to vector<8x3xf32>
    %97 = vector.shape_cast %94 : vector<8x3xf32> to vector<1x8x3xf32>
    tpu.vector_store %arg7[%c0_67, %c0_68, %c0_69], %97 {strides = array<i32>} : memref<2x8x3xf32, #tpu.memory_space<vmem>>, vector<1x8x3xf32>,
    %c1_70 = arith.constant 1 : index
    %c0_71 = arith.constant 0 : index
    %c0_72 = arith.constant 0 : index
    %98 = vector.load %arg6[%c1_70, %c0_71, %c0_72] : memref<2x8x128xf32, #tpu.memory_space<vmem>>, vector<1x8x128xf32>
    %99 = vector.shape_cast %98 : vector<1x8x128xf32> to vector<8x128xf32>
    %cst_73 = arith.constant dense<0.000000e+00> : vector<8x3xf32>
    %100 = tpu.matmul %99, %91, %cst_73 {dimension_numbers = #tpu.dot_dimension_numbers<[1], [0], [0], [1], [0, 0, 1, 1], [], []>} : vector<8x128xf32>, vector<128x3xf32>, vector<8x3xf32> -> vector<8x3xf32>
    %c1_74 = arith.constant 1 : index
    %c0_75 = arith.constant 0 : index
    %c0_76 = arith.constant 0 : index
    %101 = vector.load %arg7[%c1_74, %c0_75, %c0_76] : memref<2x8x3xf32, #tpu.memory_space<vmem>>, vector<1x8x3xf32>
    %102 = vector.shape_cast %101 : vector<1x8x3xf32> to vector<8x3xf32>
    %103 = vector.shape_cast %100 : vector<8x3xf32> to vector<1x8x3xf32>
    tpu.vector_store %arg7[%c1_74, %c0_75, %c0_76], %103 {strides = array<i32>} : memref<2x8x3xf32, #tpu.memory_space<vmem>>, vector<1x8x3xf32>,
    return
  }
  func.func @transform_0(%arg0: i32) -> (i32, i32, i32) {
    %c0_i32 = arith.constant 0 : i32
    %c0_i32_0 = arith.constant 0 : i32
    %c0_i32_1 = arith.constant 0 : i32
    return %c0_i32, %arg0, %c0_i32_0 : i32, i32, i32
  }
  func.func @transform_1(%arg0: i32) -> (i32, i32) {
    %c0_i32 = arith.constant 0 : i32
    %c0_i32_0 = arith.constant 0 : i32
    %c0_i32_1 = arith.constant 0 : i32
    return %c0_i32, %c0_i32_0 : i32, i32
  }
  func.func @transform_2(%arg0: i32) -> (i32, i32) {
    %c0_i32 = arith.constant 0 : i32
    %c0_i32_0 = arith.constant 0 : i32
    %c0_i32_1 = arith.constant 0 : i32
    return %c0_i32, %c0_i32_0 : i32, i32
  }
  func.func @transform_3(%arg0: i32) -> (i32, i32) {
    %c0_i32 = arith.constant 0 : i32
    %c0_i32_0 = arith.constant 0 : i32
    %c0_i32_1 = arith.constant 0 : i32
    return %c0_i32, %c0_i32_0 : i32, i32
  }
  func.func @transform_4(%arg0: i32) -> (i32, i32) {
    %c0_i32 = arith.constant 0 : i32
    %c0_i32_0 = arith.constant 0 : i32
    %c0_i32_1 = arith.constant 0 : i32
    return %c0_i32, %c0_i32_0 : i32, i32
  }
  func.func @transform_5(%arg0: i32) -> (i32, i32, i32) {
    %c0_i32 = arith.constant 0 : i32
    %c0_i32_0 = arith.constant 0 : i32
    %c0_i32_1 = arith.constant 0 : i32
    return %c0_i32, %arg0, %c0_i32_0 : i32, i32, i32
  }
  func.func @transform_6(%arg0: i32) -> (i32, i32, i32) {
    %c0_i32 = arith.constant 0 : i32
    %c0_i32_0 = arith.constant 0 : i32
    %c0_i32_1 = arith.constant 0 : i32
    return %c0_i32, %arg0, %c0_i32_0 : i32, i32, i32
  }
}

</mosaic_0001>

<bundles_post_ra>
// kernel: tpu_custom_call.1
= control target key start
LH: loop header
LB: loop body
LE: loop exit
PB: predicated region body
PF: predicated region fallthrough
CT: control target
= control target key end

     0   :  { %vm35_vm0 = vcmask 1043456   ;;  %v1684_v2 = vmov 0.0   ;;  %vm1685_vm1 = vmmov 0   ;;  %vm31_vm2 = vcmask 31744   ;;  %s2195_s0 = inlined_call_operand.vmem [shape: f32[2,8,4], index: 0, kind: input, shape index: {}]   ;;  %s2196_s1 = inlined_call_operand.vmem [shape: f32[4,128], index: 1, kind: input, shape index: {}]   ;;  %s2197_s2 = inlined_call_operand.vmem [shape: f32[128,128], index: 2, kind: input, shape index: {}]   ;;  %s2198_s3 = inlined_call_operand.vmem [shape: f32[128,3], index: 3, kind: input, shape index: {}]   ;;  %s2199_s4 = inlined_call_operand.vmem [shape: f32[2,128], index: 4, kind: input, shape index: {}]   ;;  %s2200_s5 = inlined_call_operand.hbm [shape: f32[2,8,128], index: 5, kind: output, shape index: {0}]   ;;  %s2201_s6 = inlined_call_operand.vmem [shape: f32[2,8,3], index: 6, kind: output, shape index: {1}]  }
   0x1   :  { %v29_v0 = vld [vmem:[%s2196_s1] sm:$0xf]  ;;  %1265 = vmatprep.subr.mxu0 %v1684_v2  ;;  %1267 = vmatprep.mubr.msk.f32.mxu0 %vm1685_vm1, %v1684_v2  ;;  %v1736_v3 = vld [vmem:[%s2197_s2 + $0x78] sm:$0xff]  ;;  %v1743_v4 = vld [vmem:[%s2197_s2 + $0x70] sm:$0xff] }
   0x2   :  { %v30_v1 = vld [vmem:[%s2195_s0] sm:$0xff]  ;;  %1266 = vmatpush3.msk.msra.mxu0 %vm35_vm0, %v29_v0  ;;  %1270 = vmatprep.subr.mxu1 %v1684_v2  ;;  %v1750_v5 = vld [vmem:[%s2197_s2 + $0x68] sm:$0xff] }
   0x3   :  { %1268 = vmatmul.mubr.msk.f32.vlgmr.msra.gmra.mxu0 %vm31_vm2, %v30_v1  ;;  %1275 = vmatprep.subr.mxu0 %v1684_v2  ;;  %v1087_v6 = vld [vmem:[%s2195_s0 + $0x8] sm:$0xff]  ;;  %v27_v7 = vld [vmem:[%s2199_s4] sm:$0x3] }
   0x4   :  { %1276 = vmatpush3.msra.mxu0 %v1736_v3  ;;  %1271 = vmatpush3.msk.msra.mxu1 %vm35_vm0, %v29_v0  ;;  %v1765_v8 = vld [vmem:[%s2197_s2 + $0x60] sm:$0xff]  ;;  %28 = vst [vmem:[#allocation2] sm:$0x3] %v27_v7 }
   0x5   :  { %1277 = vmatprep.subr.mxu0 %v1684_v2  ;;  %1272 = vmatprep.mubr.msk.f32.mxu1 %vm1685_vm1, %v1684_v2 }
   0x6   :  { %1278 = vmatpush3.msra.mxu0 %v1743_v4  ;;  %1273 = vmatmul.mubr.msk.f32.vlgmr.msra.gmra.mxu1 %vm31_vm2, %v1087_v6 }
   0x7   :  { %1279 = vmatprep.subr.mxu0 %v1684_v2  ;;  %1307 = vmatprep.mubr.msk.f32.mxu0 %vm1685_vm1, %v1684_v2 }
   0x8   :  { %12 = vsyncpa [#allocation5], 0  ;;  %1280 = vmatpush3.msra.mxu0 %v1750_v5  ;;  %1310 = vmatprep.subr.mxu1 %v1684_v2  ;;  %v1775_v9 = vld [vmem:[%s2197_s2 + $0x58] sm:$0xff]  ;;  %v1784_v10 = vld [vmem:[%s2197_s2 + $0x50] sm:$0xff]  ;;  %vm291_vm3 = vcmask 1041409  }
   0x9   :  { %1281 = vmatprep.subr.mxu0 %v1684_v2  ;;  %1311 = vmatpush3.msra.mxu1 %v1736_v3  ;;  %v1793_v11 = vld [vmem:[%s2197_s2 + $0x48] sm:$0xff]  ;;  %v1802_v12 = vld [vmem:[%s2197_s2 + $0x40] sm:$0xff]  ;;  %v1811_v13 = vld [vmem:[%s2197_s2 + $0x38] sm:$0xff] }
   0xa   :  { %1282 = vmatpush3.msra.mxu0 %v1765_v8  ;;  %1312 = vmatprep.subr.mxu1 %v1684_v2  ;;  %v1820_v14 = vld [vmem:[%s2197_s2 + $0x30] sm:$0xff]  ;;  %v1829_v15 = vld [vmem:[%s2197_s2 + $0x28] sm:$0xff]  ;;  %v1838_v16 = vld [vmem:[%s2197_s2 + $0x20] sm:$0xff] }
   0xb   :  { %1283 = vmatprep.subr.mxu0 %v1684_v2  ;;  %1313 = vmatpush3.msra.mxu1 %v1743_v4  ;;  %v1847_v17 = vld [vmem:[%s2197_s2 + $0x18] sm:$0xff]  ;;  %v1856_v18 = vld [vmem:[%s2197_s2 + $0x10] sm:$0xff]  ;;  %v1865_v19 = vld [vmem:[%s2197_s2 + $0x8] sm:$0xff] }
   0xc   :  { %1284 = vmatpush3.msra.mxu0 %v1775_v9  ;;  %1314 = vmatprep.subr.mxu1 %v1684_v2  ;;  %v1874_v20 = vld [vmem:[%s2197_s2] sm:$0xff] }
   0xd   :  { %1285 = vmatprep.subr.mxu0 %v1684_v2  ;;  %1315 = vmatpush3.msra.mxu1 %v1750_v5  ;;  %v203_v21 = vld [vmem:[#allocation2] sm:$0x3] }
   0xe   :  { %1286 = vmatpush3.msra.mxu0 %v1784_v10  ;;  %1316 = vmatprep.subr.mxu1 %v1684_v2 }
   0xf   :  { %1287 = vmatprep.subr.mxu0 %v1684_v2  ;;  %1317 = vmatpush3.msra.mxu1 %v1765_v8 }
  0x10   :  { %1288 = vmatpush3.msra.mxu0 %v1793_v11  ;;  %1318 = vmatprep.subr.mxu1 %v1684_v2 }
  0x11   :  { %1289 = vmatprep.subr.mxu0 %v1684_v2  ;;  %1319 = vmatpush3.msra.mxu1 %v1775_v9 }
  0x12   :  { %1290 = vmatpush3.msra.mxu0 %v1802_v12  ;;  %1320 = vmatprep.subr.mxu1 %v1684_v2 }
  0x13   :  { %1291 = vmatprep.subr.mxu0 %v1684_v2  ;;  %1321 = vmatpush3.msra.mxu1 %v1784_v10 }
  0x14   :  { %1292 = vmatpush3.msra.mxu0 %v1811_v13  ;;  %1322 = vmatprep.subr.mxu1 %v1684_v2 }
  0x15   :  { %1293 = vmatprep.subr.mxu0 %v1684_v2  ;;  %1323 = vmatpush3.msra.mxu1 %v1793_v11 }
  0x16   :  { %1294 = vmatpush3.msra.mxu0 %v1820_v14  ;;  %1324 = vmatprep.subr.mxu1 %v1684_v2 }
  0x17   :  { %1295 = vmatprep.subr.mxu0 %v1684_v2  ;;  %1325 = vmatpush3.msra.mxu1 %v1802_v12 }
  0x18   :  { %1296 = vmatpush3.msra.mxu0 %v1829_v15  ;;  %1326 = vmatprep.subr.mxu1 %v1684_v2 }
  0x19   :  { %1297 = vmatprep.subr.mxu0 %v1684_v2  ;;  %1327 = vmatpush3.msra.mxu1 %v1811_v13 }
  0x1a   :  { %1298 = vmatpush3.msra.mxu0 %v1838_v16  ;;  %1328 = vmatprep.subr.mxu1 %v1684_v2 }
  0x1b   :  { %1299 = vmatprep.subr.mxu0 %v1684_v2  ;;  %1329 = vmatpush3.msra.mxu1 %v1820_v14 }
  0x1c   :  { %1300 = vmatpush3.msra.mxu0 %v1847_v17  ;;  %1330 = vmatprep.subr.mxu1 %v1684_v2 }
  0x1d   :  { %1301 = vmatprep.subr.mxu0 %v1684_v2  ;;  %1331 = vmatpush3.msra.mxu1 %v1829_v15 }
  0x1e   :  { %1302 = vmatpush3.msra.mxu0 %v1856_v18  ;;  %1332 = vmatprep.subr.mxu1 %v1684_v2 }
  0x1f   :  { %1303 = vmatprep.subr.mxu0 %v1684_v2  ;;  %1333 = vmatpush3.msra.mxu1 %v1838_v16 }
  0x20   :  { %1304 = vmatpush3.msra.mxu0 %v1865_v19  ;;  %1334 = vmatprep.subr.mxu1 %v1684_v2 }
  0x21   :  { %1305 = vmatprep.subr.mxu0 %v1684_v2  ;;  %1335 = vmatpush3.msra.mxu1 %v1847_v17 }
  0x22   :  { %1306 = vmatpush3.msra.mxu0 %v1874_v20  ;;  %1336 = vmatprep.subr.mxu1 %v1684_v2 }
  0x23   :  { %1308 = vmatmul.mubr.f32.vlgmr.msra.gmra.mxu0 %v203_v21  ;;  %1337 = vmatpush3.msra.mxu1 %v1856_v18 }
  0x24   :  { %1338 = vmatprep.subr.mxu1 %v1684_v2  ;;  %1342 = vmatprep.mubr.msk.f32.mxu1 %vm1685_vm1, %v1684_v2 }
  0x25   :  { %1339 = vmatpush3.msra.mxu1 %v1865_v19  ;;  %1345 = vmatprep.subr.mxu0 %v1684_v2 }
  0x26   :  { %1340 = vmatprep.subr.mxu1 %v1684_v2  ;;  %1346 = vmatpush3.msra.mxu0 %v1736_v3 }
  0x27   :  { %1341 = vmatpush3.msra.mxu1 %v1874_v20  ;;  %1347 = vmatprep.subr.mxu0 %v1684_v2 }
  0x28   :  { %1348 = vmatpush3.msra.mxu0 %v1743_v4  ;;  %1377 = vmatprep.mubr.msk.f32.mxu0 %vm1685_vm1, %v1684_v2 }
  0x29   :  { %1349 = vmatprep.subr.mxu0 %v1684_v2  ;;  %1380 = vmatprep.subr.mxu1 %v1684_v2 }
  0x2a   :  { %1350 = vmatpush3.msra.mxu0 %v1750_v5 }
  0x2b   :  { %1351 = vmatprep.subr.mxu0 %v1684_v2 }
  0x2c   :  { %1352 = vmatpush3.msra.mxu0 %v1765_v8 }
  0x2d   :  { %1353 = vmatprep.subr.mxu0 %v1684_v2 }
  0x2e   :  { %1354 = vmatpush3.msra.mxu0 %v1775_v9 }
  0x2f   :  { %1355 = vmatprep.subr.mxu0 %v1684_v2 }
  0x30   :  { %1356 = vmatpush3.msra.mxu0 %v1784_v10 }
  0x31   :  { %1357 = vmatprep.subr.mxu0 %v1684_v2 }
  0x32   :  { %1358 = vmatpush3.msra.mxu0 %v1793_v11 }
  0x33   :  { %1359 = vmatprep.subr.mxu0 %v1684_v2 }
  0x34   :  { %1360 = vmatpush3.msra.mxu0 %v1802_v12 }
  0x35   :  { %1361 = vmatprep.subr.mxu0 %v1684_v2 }
  0x36   :  { %1362 = vmatpush3.msra.mxu0 %v1811_v13 }
  0x37   :  { %1363 = vmatprep.subr.mxu0 %v1684_v2 }
  0x38   :  { %1364 = vmatpush3.msra.mxu0 %v1820_v14 }
  0x39   :  { %1365 = vmatprep.subr.mxu0 %v1684_v2 }
  0x3a   :  { %1366 = vmatpush3.msra.mxu0 %v1829_v15 }
  0x3b   :  { %1367 = vmatprep.subr.mxu0 %v1684_v2 }
  0x3c   :  { %1368 = vmatpush3.msra.mxu0 %v1838_v16 }
  0x3d   :  { %1369 = vmatprep.subr.mxu0 %v1684_v2 }
  0x3e   :  { %1370 = vmatpush3.msra.mxu0 %v1847_v17 }
  0x3f   :  { %1371 = vmatprep.subr.mxu0 %v1684_v2 }
  0x40   :  { %1372 = vmatpush3.msra.mxu0 %v1856_v18 }
  0x41   :  { %1373 = vmatprep.subr.mxu0 %v1684_v2 }
  0x42   :  { %1374 = vmatpush3.msra.mxu0 %v1865_v19 }
  0x43   :  { %1375 = vmatprep.subr.mxu0 %v1684_v2 }
  0x44   :  { %1376 = vmatpush3.msra.mxu0 %v1874_v20 }
  0x45   :  { %1415 = vmatprep.subr.mxu0 %v1684_v2 }
  0xc3   :  { %v105_v22 = vpop.f32.mrf.mxu0 }
  0xc4   :  { %109 = vst [vmem:[#allocation3] sm:$0xff] %v105_v22 }
  0xc5   :  { %v1269_v23 = vpop.f32.mrf.mxu0 }
  0xc6   :  { %v181_v24 = vpop.f32.mrf.mxu1 }
  0xc7   :  { %186 = vst [vmem:[#allocation3 + $0x8] sm:$0xff] %v181_v24 }
  0xc8   :  { %v1274_v25 = vpop.f32.mrf.mxu1 }
  0xcb   :  { %v204_v26 = vld [vmem:[#allocation3] sm:$0x1]  ;;  %v286_v37 = vld [vmem:[#allocation3 + $0x1] sm:$0x1]  ;;  %v374_v48 = vld [vmem:[#allocation3 + $0x2] sm:$0x1] }
  0xcc   :  { %v461_v59 = vld [vmem:[#allocation3 + $0x3] sm:$0x1]  ;;  %v548_v23 = vld [vmem:[#allocation3 + $0x4] sm:$0x1] }
  0xce   :  { %v205_v27 = vld [vmem:[#allocation3 + $0x8] sm:$0x1]  ;;  %v287_v41 = vld [vmem:[#allocation3 + $0x9] sm:$0x1]  ;;  %v375_v52 = vld [vmem:[#allocation3 + $0xa] sm:$0x1] }
  0xcf   :  { %v462_v63 = vld [vmem:[#allocation3 + $0xb] sm:$0x1] }
  0xe3   :  { %v272_v28 = vpop.f32.mrf.mxu0 }
  0xe4   :  { %v277_v29 = vrot.slane %v272_v28, 1  ;;  %v280_v30 = vadd.f32 %v272_v28, %v204_v26 }
  0xe5   :  { %v1309_v31 = vpop.f32.mrf.mxu0 }
  0xe6   :  { %v281_v32 = vadd.f32 %v277_v29, %v205_v27  ;;  %1630 = vtanh.f32 %v280_v30  ;;  %v549_v27 = vld [vmem:[#allocation3 + $0xc] sm:$0x1] }
  0xe8   :  { %1632 = vtanh.f32 %v281_v32 }
  0xf3   :  { %v1631_v33 = vpop.eup %1630 }
  0xf4   :  { %284 = vst [vmem:[#allocation4] sm:$0x1] %v1631_v33 }
  0xf5   :  { %v1633_v34 = vpop.eup %1632 }
  0xf6   :  { %285 = vst [vmem:[#allocation4 + $0x8] sm:$0x1] %v1633_v34  ;;  %v290_v35 = vrot.slane %v1633_v34, 7 }
  0xf8   :  { %v292_v36 = vsel %vm291_vm3, %v290_v35, %v1631_v33 }
  0xf9   :  { %1343 = vmatmul.mubr.f32.vlgmr.msra.gmra.mxu1 %v292_v36  ;;  %v723_v36 = vld [vmem:[#allocation3 + $0xe] sm:$0x1] }
  0xfa   :  { %1381 = vmatpush3.msra.mxu1 %v1736_v3  ;;  %1412 = vmatprep.mubr.msk.f32.mxu1 %vm1685_vm1, %v1684_v2 }
  0xfb   :  { %1382 = vmatprep.subr.mxu1 %v1684_v2 }
  0xfc   :  { %1383 = vmatpush3.msra.mxu1 %v1743_v4 }
  0xfd   :  { %1384 = vmatprep.subr.mxu1 %v1684_v2 }
  0xfe   :  { %1385 = vmatpush3.msra.mxu1 %v1750_v5 }
  0xff   :  { %1386 = vmatprep.subr.mxu1 %v1684_v2 }
 0x100   :  { %1387 = vmatpush3.msra.mxu1 %v1765_v8 }
 0x101   :  { %1388 = vmatprep.subr.mxu1 %v1684_v2 }
 0x102   :  { %1389 = vmatpush3.msra.mxu1 %v1775_v9 }
 0x103   :  { %1390 = vmatprep.subr.mxu1 %v1684_v2 }
 0x104   :  { %1391 = vmatpush3.msra.mxu1 %v1784_v10 }
 0x105   :  { %1392 = vmatprep.subr.mxu1 %v1684_v2 }
 0x106   :  { %1393 = vmatpush3.msra.mxu1 %v1793_v11 }
 0x107   :  { %1394 = vmatprep.subr.mxu1 %v1684_v2 }
 0x108   :  { %1395 = vmatpush3.msra.mxu1 %v1802_v12 }
 0x109   :  { %1396 = vmatprep.subr.mxu1 %v1684_v2 }
 0x10a   :  { %1397 = vmatpush3.msra.mxu1 %v1811_v13 }
 0x10b   :  { %1398 = vmatprep.subr.mxu1 %v1684_v2 }
 0x10c   :  { %1399 = vmatpush3.msra.mxu1 %v1820_v14 }
 0x10d   :  { %1400 = vmatprep.subr.mxu1 %v1684_v2 }
 0x10e   :  { %1401 = vmatpush3.msra.mxu1 %v1829_v15 }
 0x10f   :  { %1402 = vmatprep.subr.mxu1 %v1684_v2 }
 0x110   :  { %1403 = vmatpush3.msra.mxu1 %v1838_v16 }
 0x111   :  { %1404 = vmatprep.subr.mxu1 %v1684_v2 }
 0x112   :  { %1405 = vmatpush3.msra.mxu1 %v1847_v17 }
 0x113   :  { %1406 = vmatprep.subr.mxu1 %v1684_v2 }
 0x114   :  { %1407 = vmatpush3.msra.mxu1 %v1856_v18 }
 0x115   :  { %1408 = vmatprep.subr.mxu1 %v1684_v2 }
 0x116   :  { %1409 = vmatpush3.msra.mxu1 %v1865_v19 }
 0x117   :  { %1410 = vmatprep.subr.mxu1 %v1684_v2 }
 0x118   :  { %1411 = vmatpush3.msra.mxu1 %v1874_v20 }
 0x119   :  { %1450 = vmatprep.subr.mxu1 %v1684_v2 }
 0x1b9   :  { %v360_v38 = vpop.f32.mrf.mxu1 }
 0x1ba   :  { %v365_v39 = vrot.slane %v360_v38, 1  ;;  %v368_v40 = vadd.f32 %v360_v38, %v286_v37 }
 0x1bb   :  { %v1344_v42 = vpop.f32.mrf.mxu1 }
 0x1bc   :  { %v369_v43 = vadd.f32 %v365_v39, %v287_v41  ;;  %1634 = vtanh.f32 %v368_v40 }
 0x1be   :  { %1636 = vtanh.f32 %v369_v43  ;;  %v914_v43 = vld [vmem:[%s2198_s3 + $0x60] sm:$0xff] }
 0x1c9   :  { %v1635_v44 = vpop.eup %1634 }
 0x1ca   :  { %372 = vst [vmem:[#allocation4 + $0x1] sm:$0x1] %v1635_v44 }
 0x1cb   :  { %v1637_v45 = vpop.eup %1636 }
 0x1cc   :  { %373 = vst [vmem:[#allocation4 + $0x9] sm:$0x1] %v1637_v45  ;;  %v378_v46 = vrot.slane %v1637_v45, 7  ;;  %v912_v45 = vld [vmem:[%s2198_s3 + $0x50] sm:$0xff] }
 0x1ce   :  { %v379_v47 = vsel %vm291_vm3, %v378_v46, %v1635_v44  ;;  %v913_v44 = vld [vmem:[%s2198_s3 + $0x58] sm:$0xff]  ;;  %v911_v46 = vld [vmem:[%s2198_s3 + $0x48] sm:$0xff] }
 0x1cf   :  { %1378 = vmatmul.mubr.f32.vlgmr.msra.gmra.mxu0 %v379_v47  ;;  %v910_v47 = vld [vmem:[%s2198_s3 + $0x40] sm:$0xff] }
 0x1d0   :  { %1416 = vmatpush3.msra.mxu0 %v1736_v3  ;;  %1447 = vmatprep.mubr.msk.f32.mxu0 %vm1685_vm1, %v1684_v2 }
 0x1d1   :  { %1417 = vmatprep.subr.mxu0 %v1684_v2 }
 0x1d2   :  { %1418 = vmatpush3.msra.mxu0 %v1743_v4 }
 0x1d3   :  { %1419 = vmatprep.subr.mxu0 %v1684_v2 }
 0x1d4   :  { %1420 = vmatpush3.msra.mxu0 %v1750_v5 }
 0x1d5   :  { %1421 = vmatprep.subr.mxu0 %v1684_v2 }
 0x1d6   :  { %1422 = vmatpush3.msra.mxu0 %v1765_v8 }
 0x1d7   :  { %1423 = vmatprep.subr.mxu0 %v1684_v2 }
 0x1d8   :  { %1424 = vmatpush3.msra.mxu0 %v1775_v9 }
 0x1d9   :  { %1425 = vmatprep.subr.mxu0 %v1684_v2 }
 0x1da   :  { %1426 = vmatpush3.msra.mxu0 %v1784_v10 }
 0x1db   :  { %1427 = vmatprep.subr.mxu0 %v1684_v2 }
 0x1dc   :  { %1428 = vmatpush3.msra.mxu0 %v1793_v11 }
 0x1dd   :  { %1429 = vmatprep.subr.mxu0 %v1684_v2 }
 0x1de   :  { %1430 = vmatpush3.msra.mxu0 %v1802_v12 }
 0x1df   :  { %1431 = vmatprep.subr.mxu0 %v1684_v2 }
 0x1e0   :  { %1432 = vmatpush3.msra.mxu0 %v1811_v13 }
 0x1e1   :  { %1433 = vmatprep.subr.mxu0 %v1684_v2 }
 0x1e2   :  { %1434 = vmatpush3.msra.mxu0 %v1820_v14 }
 0x1e3   :  { %1435 = vmatprep.subr.mxu0 %v1684_v2 }
 0x1e4   :  { %1436 = vmatpush3.msra.mxu0 %v1829_v15 }
 0x1e5   :  { %1437 = vmatprep.subr.mxu0 %v1684_v2 }
 0x1e6   :  { %1438 = vmatpush3.msra.mxu0 %v1838_v16 }
 0x1e7   :  { %1439 = vmatprep.subr.mxu0 %v1684_v2 }
 0x1e8   :  { %1440 = vmatpush3.msra.mxu0 %v1847_v17 }
 0x1e9   :  { %1441 = vmatprep.subr.mxu0 %v1684_v2 }
 0x1ea   :  { %1442 = vmatpush3.msra.mxu0 %v1856_v18 }
 0x1eb   :  { %1443 = vmatprep.subr.mxu0 %v1684_v2 }
 0x1ec   :  { %1444 = vmatpush3.msra.mxu0 %v1865_v19 }
 0x1ed   :  { %1445 = vmatprep.subr.mxu0 %v1684_v2 }
 0x1ee   :  { %1446 = vmatpush3.msra.mxu0 %v1874_v20 }
 0x1ef   :  { %1485 = vmatprep.subr.mxu0 %v1684_v2 }
 0x28f   :  { %v447_v49 = vpop.f32.mrf.mxu0 }
 0x290   :  { %v452_v50 = vrot.slane %v447_v49, 1  ;;  %v455_v51 = vadd.f32 %v447_v49, %v374_v48  ;;  %v909_v48 = vld [vmem:[%s2198_s3 + $0x38] sm:$0xff]  ;;  %v908_v49 = vld [vmem:[%s2198_s3 + $0x30] sm:$0xff] }
 0x291   :  { %v1379_v53 = vpop.f32.mrf.mxu0 }
 0x292   :  { %v456_v54 = vadd.f32 %v452_v50, %v375_v52  ;;  %1638 = vtanh.f32 %v455_v51  ;;  %v907_v50 = vld [vmem:[%s2198_s3 + $0x28] sm:$0xff]  ;;  %v906_v51 = vld [vmem:[%s2198_s3 + $0x20] sm:$0xff]  ;;  %v905_v52 = vld [vmem:[%s2198_s3 + $0x18] sm:$0xff] }
 0x293   :  { %v904_v53 = vld [vmem:[%s2198_s3 + $0x10] sm:$0xff] }
 0x294   :  { %1640 = vtanh.f32 %v456_v54  ;;  %v903_v54 = vld [vmem:[%s2198_s3 + $0x8] sm:$0xff] }
 0x29f   :  { %v1639_v55 = vpop.eup %1638 }
 0x2a0   :  { %459 = vst [vmem:[#allocation4 + $0x2] sm:$0x1] %v1639_v55 }
 0x2a1   :  { %v1641_v56 = vpop.eup %1640 }
 0x2a2   :  { %460 = vst [vmem:[#allocation4 + $0xa] sm:$0x1] %v1641_v56  ;;  %v465_v57 = vrot.slane %v1641_v56, 7  ;;  %v809_v56 = vld [vmem:[#allocation3 + $0x7] sm:$0x1] }
 0x2a4   :  { %v466_v58 = vsel %vm291_vm3, %v465_v57, %v1639_v55  ;;  %v902_v55 = vld [vmem:[%s2198_s3] sm:$0xff] }
 0x2a5   :  { %1413 = vmatmul.mubr.f32.vlgmr.msra.gmra.mxu1 %v466_v58 }
 0x2a6   :  { %1451 = vmatpush3.msra.mxu1 %v1736_v3  ;;  %1482 = vmatprep.mubr.msk.f32.mxu1 %vm1685_vm1, %v1684_v2 }
 0x2a7   :  { %1452 = vmatprep.subr.mxu1 %v1684_v2 }
 0x2a8   :  { %1453 = vmatpush3.msra.mxu1 %v1743_v4 }
 0x2a9   :  { %1454 = vmatprep.subr.mxu1 %v1684_v2 }
 0x2aa   :  { %1455 = vmatpush3.msra.mxu1 %v1750_v5 }
 0x2ab   :  { %1456 = vmatprep.subr.mxu1 %v1684_v2 }
 0x2ac   :  { %1457 = vmatpush3.msra.mxu1 %v1765_v8 }
 0x2ad   :  { %1458 = vmatprep.subr.mxu1 %v1684_v2 }
 0x2ae   :  { %1459 = vmatpush3.msra.mxu1 %v1775_v9 }
 0x2af   :  { %1460 = vmatprep.subr.mxu1 %v1684_v2 }
 0x2b0   :  { %1461 = vmatpush3.msra.mxu1 %v1784_v10 }
 0x2b1   :  { %1462 = vmatprep.subr.mxu1 %v1684_v2 }
 0x2b2   :  { %1463 = vmatpush3.msra.mxu1 %v1793_v11 }
 0x2b3   :  { %1464 = vmatprep.subr.mxu1 %v1684_v2 }
 0x2b4   :  { %1465 = vmatpush3.msra.mxu1 %v1802_v12 }
 0x2b5   :  { %1466 = vmatprep.subr.mxu1 %v1684_v2 }
 0x2b6   :  { %1467 = vmatpush3.msra.mxu1 %v1811_v13 }
 0x2b7   :  { %1468 = vmatprep.subr.mxu1 %v1684_v2 }
 0x2b8   :  { %1469 = vmatpush3.msra.mxu1 %v1820_v14 }
 0x2b9   :  { %1470 = vmatprep.subr.mxu1 %v1684_v2 }
 0x2ba   :  { %1471 = vmatpush3.msra.mxu1 %v1829_v15 }
 0x2bb   :  { %1472 = vmatprep.subr.mxu1 %v1684_v2 }
 0x2bc   :  { %1473 = vmatpush3.msra.mxu1 %v1838_v16 }
 0x2bd   :  { %1474 = vmatprep.subr.mxu1 %v1684_v2 }
 0x2be   :  { %1475 = vmatpush3.msra.mxu1 %v1847_v17 }
 0x2bf   :  { %1476 = vmatprep.subr.mxu1 %v1684_v2 }
 0x2c0   :  { %1477 = vmatpush3.msra.mxu1 %v1856_v18 }
 0x2c1   :  { %1478 = vmatprep.subr.mxu1 %v1684_v2 }
 0x2c2   :  { %1479 = vmatpush3.msra.mxu1 %v1865_v19 }
 0x2c3   :  { %1480 = vmatprep.subr.mxu1 %v1684_v2 }
 0x2c4   :  { %1481 = vmatpush3.msra.mxu1 %v1874_v20 }
 0x2c5   :  { %1520 = vmatprep.subr.mxu1 %v1684_v2 }
 0x365   :  { %v534_v60 = vpop.f32.mrf.mxu1 }
 0x366   :  { %v539_v61 = vrot.slane %v534_v60, 1  ;;  %v542_v62 = vadd.f32 %v534_v60, %v461_v59  ;;  %v810_v60 = vld [vmem:[#allocation3 + $0xf] sm:$0x1] }
 0x367   :  { %v1414_v0 = vpop.f32.mrf.mxu1 }
 0x368   :  { %v543_v1 = vadd.f32 %v539_v61, %v462_v63  ;;  %1642 = vtanh.f32 %v542_v62 }
 0x36a   :  { %1644 = vtanh.f32 %v543_v1 }
 0x375   :  { %v1643_v6 = vpop.eup %1642 }
 0x376   :  { %546 = vst [vmem:[#allocation4 + $0x3] sm:$0x1] %v1643_v6 }
 0x377   :  { %v1645_v7 = vpop.eup %1644 }
 0x378   :  { %547 = vst [vmem:[#allocation4 + $0xb] sm:$0x1] %v1645_v7  ;;  %v552_v21 = vrot.slane %v1645_v7, 7 }
 0x37a   :  { %v553_v22 = vsel %vm291_vm3, %v552_v21, %v1643_v6 }
 0x37b   :  { %1448 = vmatmul.mubr.f32.vlgmr.msra.gmra.mxu0 %v553_v22 }
 0x37c   :  { %1486 = vmatpush3.msra.mxu0 %v1736_v3  ;;  %1517 = vmatprep.mubr.msk.f32.mxu0 %vm1685_vm1, %v1684_v2 }
 0x37d   :  { %1487 = vmatprep.subr.mxu0 %v1684_v2 }
 0x37e   :  { %1488 = vmatpush3.msra.mxu0 %v1743_v4 }
 0x37f   :  { %1489 = vmatprep.subr.mxu0 %v1684_v2 }
 0x380   :  { %1490 = vmatpush3.msra.mxu0 %v1750_v5 }
 0x381   :  { %1491 = vmatprep.subr.mxu0 %v1684_v2 }
 0x382   :  { %1492 = vmatpush3.msra.mxu0 %v1765_v8 }
 0x383   :  { %1493 = vmatprep.subr.mxu0 %v1684_v2 }
 0x384   :  { %1494 = vmatpush3.msra.mxu0 %v1775_v9 }
 0x385   :  { %1495 = vmatprep.subr.mxu0 %v1684_v2 }
 0x386   :  { %1496 = vmatpush3.msra.mxu0 %v1784_v10 }
 0x387   :  { %1497 = vmatprep.subr.mxu0 %v1684_v2 }
 0x388   :  { %1498 = vmatpush3.msra.mxu0 %v1793_v11 }
 0x389   :  { %1499 = vmatprep.subr.mxu0 %v1684_v2 }
 0x38a   :  { %1500 = vmatpush3.msra.mxu0 %v1802_v12 }
 0x38b   :  { %1501 = vmatprep.subr.mxu0 %v1684_v2 }
 0x38c   :  { %1502 = vmatpush3.msra.mxu0 %v1811_v13 }
 0x38d   :  { %1503 = vmatprep.subr.mxu0 %v1684_v2 }
 0x38e   :  { %1504 = vmatpush3.msra.mxu0 %v1820_v14 }
 0x38f   :  { %1505 = vmatprep.subr.mxu0 %v1684_v2 }
 0x390   :  { %1506 = vmatpush3.msra.mxu0 %v1829_v15 }
 0x391   :  { %1507 = vmatprep.subr.mxu0 %v1684_v2 }
 0x392   :  { %1508 = vmatpush3.msra.mxu0 %v1838_v16 }
 0x393   :  { %1509 = vmatprep.subr.mxu0 %v1684_v2 }
 0x394   :  { %1510 = vmatpush3.msra.mxu0 %v1847_v17 }
 0x395   :  { %1511 = vmatprep.subr.mxu0 %v1684_v2 }
 0x396   :  { %1512 = vmatpush3.msra.mxu0 %v1856_v18 }
 0x397   :  { %1513 = vmatprep.subr.mxu0 %v1684_v2 }
 0x398   :  { %1514 = vmatpush3.msra.mxu0 %v1865_v19 }
 0x399   :  { %1515 = vmatprep.subr.mxu0 %v1684_v2 }
 0x39a   :  { %1516 = vmatpush3.msra.mxu0 %v1874_v20 }
 0x39b   :  { %1555 = vmatprep.subr.mxu0 %v1684_v2 }
 0x43b   :  { %v621_v24 = vpop.f32.mrf.mxu0 }
 0x43c   :  { %v626_v25 = vrot.slane %v621_v24, 1  ;;  %v629_v26 = vadd.f32 %v621_v24, %v548_v23 }
 0x43d   :  { %v1449_v28 = vpop.f32.mrf.mxu0 }
 0x43e   :  { %v630_v29 = vadd.f32 %v626_v25, %v549_v27  ;;  %1646 = vtanh.f32 %v629_v26 }
 0x440   :  { %1648 = vtanh.f32 %v630_v29 }
 0x44b   :  { %v1647_v30 = vpop.eup %1646 }
 0x44c   :  { %633 = vst [vmem:[#allocation4 + $0x4] sm:$0x1] %v1647_v30 }
 0x44d   :  { %v1649_v31 = vpop.eup %1648 }
 0x44e   :  { %634 = vst [vmem:[#allocation4 + $0xc] sm:$0x1] %v1649_v31  ;;  %v639_v32 = vrot.slane %v1649_v31, 7 }
 0x450   :  { %v640_v33 = vsel %vm291_vm3, %v639_v32, %v1647_v30 }
 0x451   :  { %1483 = vmatmul.mubr.f32.vlgmr.msra.gmra.mxu1 %v640_v33 }
 0x452   :  { %1521 = vmatpush3.msra.mxu1 %v1736_v3  ;;  %1552 = vmatprep.mubr.msk.f32.mxu1 %vm1685_vm1, %v1684_v2  ;;  %v635_v3 = vld [vmem:[#allocation3 + $0x5] sm:$0x1] }
 0x453   :  { %1522 = vmatprep.subr.mxu1 %v1684_v2 }
 0x454   :  { %1523 = vmatpush3.msra.mxu1 %v1743_v4 }
 0x455   :  { %1524 = vmatprep.subr.mxu1 %v1684_v2 }
 0x456   :  { %1525 = vmatpush3.msra.mxu1 %v1750_v5 }
 0x457   :  { %1526 = vmatprep.subr.mxu1 %v1684_v2 }
 0x458   :  { %1527 = vmatpush3.msra.mxu1 %v1765_v8 }
 0x459   :  { %1528 = vmatprep.subr.mxu1 %v1684_v2 }
 0x45a   :  { %1529 = vmatpush3.msra.mxu1 %v1775_v9  ;;  %v636_v9 = vld [vmem:[#allocation3 + $0xd] sm:$0x1] }
 0x45b   :  { %1530 = vmatprep.subr.mxu1 %v1684_v2 }
 0x45c   :  { %1531 = vmatpush3.msra.mxu1 %v1784_v10 }
 0x45d   :  { %1532 = vmatprep.subr.mxu1 %v1684_v2 }
 0x45e   :  { %1533 = vmatpush3.msra.mxu1 %v1793_v11 }
 0x45f   :  { %1534 = vmatprep.subr.mxu1 %v1684_v2 }
 0x460   :  { %1535 = vmatpush3.msra.mxu1 %v1802_v12 }
 0x461   :  { %1536 = vmatprep.subr.mxu1 %v1684_v2 }
 0x462   :  { %1537 = vmatpush3.msra.mxu1 %v1811_v13 }
 0x463   :  { %1538 = vmatprep.subr.mxu1 %v1684_v2 }
 0x464   :  { %1539 = vmatpush3.msra.mxu1 %v1820_v14 }
 0x465   :  { %1540 = vmatprep.subr.mxu1 %v1684_v2 }
 0x466   :  { %1541 = vmatpush3.msra.mxu1 %v1829_v15 }
 0x467   :  { %1542 = vmatprep.subr.mxu1 %v1684_v2 }
 0x468   :  { %1543 = vmatpush3.msra.mxu1 %v1838_v16  ;;  %v917_v16 = vld [vmem:[%s2198_s3 + $0x78] sm:$0xff] }
 0x469   :  { %1544 = vmatprep.subr.mxu1 %v1684_v2 }
 0x46a   :  { %1545 = vmatpush3.msra.mxu1 %v1847_v17  ;;  %v916_v17 = vld [vmem:[%s2198_s3 + $0x70] sm:$0xff] }
 0x46b   :  { %1546 = vmatprep.subr.mxu1 %v1684_v2 }
 0x46c   :  { %1547 = vmatpush3.msra.mxu1 %v1856_v18  ;;  %v915_v18 = vld [vmem:[%s2198_s3 + $0x68] sm:$0xff]  ;;  %s1686_s3 = smov [#allocation4]  }
 0x46d   :  { %1548 = vmatprep.subr.mxu1 %v1684_v2  ;;  %s1070_s0 = sshll.u32 %s1686_s3, 4  ;;  %s1071_s0 = int_to_ptr.vmem [resolvable:$true] %s1070_s0 }
 0x46e   :  { %1549 = vmatpush3.msra.mxu1 %v1865_v19  ;;  %v722_v19 = vld [vmem:[#allocation3 + $0x6] sm:$0x1]  ;;  %s1662_s4 = scalar_lea.vmem %s1071_s0, 256  ;;  %p1667_p1 = scmp.lt.s32.totalorder %s1071_s0, %s1071_s0 }
 0x46f   :  { %1550 = vmatprep.subr.mxu1 %v1684_v2  ;;  %p1663_p0 = scmp.ne.s32.totalorder %s1071_s0, %s1662_s4  ;;  %p1668_p2 = scmp.lt.s32.totalorder %s1662_s4, %s1662_s4 }
 0x470   :  { %1551 = vmatpush3.msra.mxu1 %v1874_v20 }
 0x471   :  { %1590 = vmatprep.subr.mxu1 %v1684_v2  ;;  %p1669_p3 = por %p1668_p2, %p1667_p1 }
 0x473   :  { %p1670_p4 = pnand %p1669_p3, %p1663_p0 }
 0x511   :  { %v708_v4 = vpop.f32.mrf.mxu1 }
 0x512   :  { %v713_v5 = vrot.slane %v708_v4, 1  ;;  %v716_v8 = vadd.f32 %v708_v4, %v635_v3 }
 0x513   :  { %v1484_v10 = vpop.f32.mrf.mxu1 }
 0x514   :  { %v717_v11 = vadd.f32 %v713_v5, %v636_v9  ;;  %1650 = vtanh.f32 %v716_v8 }
 0x516   :  { %1652 = vtanh.f32 %v717_v11 }
 0x521   :  { %v1651_v12 = vpop.eup %1650 }
 0x522   :  { %720 = vst [vmem:[#allocation4 + $0x5] sm:$0x1] %v1651_v12 }
 0x523   :  { %v1653_v13 = vpop.eup %1652 }
 0x524   :  { %721 = vst [vmem:[#allocation4 + $0xd] sm:$0x1] %v1653_v13  ;;  %v726_v14 = vrot.slane %v1653_v13, 7 }
 0x526   :  { %v727_v15 = vsel %vm291_vm3, %v726_v14, %v1651_v12 }
 0x527   :  { %1518 = vmatmul.mubr.f32.vlgmr.msra.gmra.mxu0 %v727_v15 }
 0x528   :  { %1587 = vmatprep.mubr.msk.f32.mxu0 %vm1685_vm1, %v1684_v2  ;;  %1556 = vmatpush3.msra.mxu0 %v917_v16 }
 0x529   :  { %1557 = vmatprep.subr.mxu0 %v1684_v2 }
 0x52a   :  { %1558 = vmatpush3.msra.mxu0 %v916_v17 }
 0x52b   :  { %1559 = vmatprep.subr.mxu0 %v1684_v2 }
 0x52c   :  { %1560 = vmatpush3.msra.mxu0 %v915_v18 }
 0x52d   :  { %1561 = vmatprep.subr.mxu0 %v1684_v2 }
 0x52e   :  { %1562 = vmatpush3.msra.mxu0 %v914_v43 }
 0x52f   :  { %1563 = vmatprep.subr.mxu0 %v1684_v2 }
 0x530   :  { %1564 = vmatpush3.msra.mxu0 %v913_v44 }
 0x531   :  { %1565 = vmatprep.subr.mxu0 %v1684_v2 }
 0x532   :  { %1566 = vmatpush3.msra.mxu0 %v912_v45 }
 0x533   :  { %1567 = vmatprep.subr.mxu0 %v1684_v2 }
 0x534   :  { %1568 = vmatpush3.msra.mxu0 %v911_v46 }
 0x535   :  { %1569 = vmatprep.subr.mxu0 %v1684_v2 }
 0x536   :  { %1570 = vmatpush3.msra.mxu0 %v910_v47 }
 0x537   :  { %1571 = vmatprep.subr.mxu0 %v1684_v2 }
 0x538   :  { %1572 = vmatpush3.msra.mxu0 %v909_v48 }
 0x539   :  { %1573 = vmatprep.subr.mxu0 %v1684_v2 }
 0x53a   :  { %1574 = vmatpush3.msra.mxu0 %v908_v49 }
 0x53b   :  { %1575 = vmatprep.subr.mxu0 %v1684_v2 }
 0x53c   :  { %1576 = vmatpush3.msra.mxu0 %v907_v50 }
 0x53d   :  { %1577 = vmatprep.subr.mxu0 %v1684_v2 }
 0x53e   :  { %1578 = vmatpush3.msra.mxu0 %v906_v51 }
 0x53f   :  { %1579 = vmatprep.subr.mxu0 %v1684_v2 }
 0x540   :  { %1580 = vmatpush3.msra.mxu0 %v905_v52 }
 0x541   :  { %1581 = vmatprep.subr.mxu0 %v1684_v2 }
 0x542   :  { %1582 = vmatpush3.msra.mxu0 %v904_v53 }
 0x543   :  { %1583 = vmatprep.subr.mxu0 %v1684_v2 }
 0x544   :  { %1584 = vmatpush3.msra.mxu0 %v903_v54 }
 0x545   :  { %1585 = vmatprep.subr.mxu0 %v1684_v2 }
 0x546   :  { %1586 = vmatpush3.msra.mxu0 %v902_v55 }
 0x5e7   :  { %v795_v20 = vpop.f32.mrf.mxu0 }
 0x5e8   :  { %v800_v34 = vrot.slane %v795_v20, 1  ;;  %v803_v35 = vadd.f32 %v795_v20, %v722_v19 }
 0x5e9   :  { %v1519_v37 = vpop.f32.mrf.mxu0 }
 0x5ea   :  { %v804_v38 = vadd.f32 %v800_v34, %v723_v36  ;;  %1654 = vtanh.f32 %v803_v35 }
 0x5ec   :  { %1656 = vtanh.f32 %v804_v38 }
 0x5f7   :  { %v1655_v39 = vpop.eup %1654 }
 0x5f8   :  { %807 = vst [vmem:[#allocation4 + $0x6] sm:$0x1] %v1655_v39 }
 0x5f9   :  { %v1657_v40 = vpop.eup %1656 }
 0x5fa   :  { %808 = vst [vmem:[#allocation4 + $0xe] sm:$0x1] %v1657_v40  ;;  %v813_v41 = vrot.slane %v1657_v40, 7 }
 0x5fc   :  { %v814_v42 = vsel %vm291_vm3, %v813_v41, %v1655_v39 }
 0x5fd   :  { %1553 = vmatmul.mubr.f32.vlgmr.msra.gmra.mxu1 %v814_v42 }
 0x5fe   :  { %1591 = vmatpush3.msra.mxu1 %v917_v16  ;;  %1622 = vmatprep.mubr.msk.f32.mxu1 %vm1685_vm1, %v1684_v2 }
 0x5ff   :  { %1592 = vmatprep.subr.mxu1 %v1684_v2 }
 0x600   :  { %1593 = vmatpush3.msra.mxu1 %v916_v17 }
 0x601   :  { %1594 = vmatprep.subr.mxu1 %v1684_v2 }
 0x602   :  { %1595 = vmatpush3.msra.mxu1 %v915_v18 }
 0x603   :  { %1596 = vmatprep.subr.mxu1 %v1684_v2 }
 0x604   :  { %1597 = vmatpush3.msra.mxu1 %v914_v43 }
 0x605   :  { %1598 = vmatprep.subr.mxu1 %v1684_v2 }
 0x606   :  { %1599 = vmatpush3.msra.mxu1 %v913_v44 }
 0x607   :  { %1600 = vmatprep.subr.mxu1 %v1684_v2 }
 0x608   :  { %1601 = vmatpush3.msra.mxu1 %v912_v45 }
 0x609   :  { %1602 = vmatprep.subr.mxu1 %v1684_v2 }
 0x60a   :  { %1603 = vmatpush3.msra.mxu1 %v911_v46 }
 0x60b   :  { %1604 = vmatprep.subr.mxu1 %v1684_v2 }
 0x60c   :  { %1605 = vmatpush3.msra.mxu1 %v910_v47 }
 0x60d   :  { %1606 = vmatprep.subr.mxu1 %v1684_v2 }
 0x60e   :  { %1607 = vmatpush3.msra.mxu1 %v909_v48 }
 0x60f   :  { %1608 = vmatprep.subr.mxu1 %v1684_v2 }
 0x610   :  { %1609 = vmatpush3.msra.mxu1 %v908_v49 }
 0x611   :  { %1610 = vmatprep.subr.mxu1 %v1684_v2 }
 0x612   :  { %1611 = vmatpush3.msra.mxu1 %v907_v50 }
 0x613   :  { %1612 = vmatprep.subr.mxu1 %v1684_v2 }
 0x614   :  { %1613 = vmatpush3.msra.mxu1 %v906_v51 }
 0x615   :  { %1614 = vmatprep.subr.mxu1 %v1684_v2 }
 0x616   :  { %1615 = vmatpush3.msra.mxu1 %v905_v52 }
 0x617   :  { %1616 = vmatprep.subr.mxu1 %v1684_v2 }
 0x618   :  { %1617 = vmatpush3.msra.mxu1 %v904_v53 }
 0x619   :  { %1618 = vmatprep.subr.mxu1 %v1684_v2 }
 0x61a   :  { %1619 = vmatpush3.msra.mxu1 %v903_v54 }
 0x61b   :  { %1620 = vmatprep.subr.mxu1 %v1684_v2 }
 0x61c   :  { %1621 = vmatpush3.msra.mxu1 %v902_v55 }
 0x6bd   :  { %v882_v57 = vpop.f32.mrf.mxu1 }
 0x6be   :  { %v887_v58 = vrot.slane %v882_v57, 1  ;;  %v890_v59 = vadd.f32 %v882_v57, %v809_v56 }
 0x6bf   :  { %v1554_v61 = vpop.f32.mrf.mxu1 }
 0x6c0   :  { %v891_v62 = vadd.f32 %v887_v58, %v810_v60  ;;  %1658 = vtanh.f32 %v890_v59 }
 0x6c2   :  { %1660 = vtanh.f32 %v891_v62 }
 0x6cd   :  { %v1659_v63 = vpop.eup %1658 }
 0x6ce   :  { %894 = vst [vmem:[#allocation4 + $0x7] sm:$0x1] %v1659_v63 }
 0x6cf   :  { %v1661_v0 = vpop.eup %1660 }
 0x6d0   :  { %895 = vst [vmem:[#allocation4 + $0xf] sm:$0x1] %v1661_v0  ;;  %v898_v1 = vrot.slane %v1661_v0, 7 }
 0x6d2   :  { %v899_v6 = vsel %vm291_vm3, %v898_v1, %v1659_v63 }
 0x6d3   :  { %901 = vst [vmem:[#allocation2] sm:$0x3] %v899_v6 }
 0x6d5   :  { %v918_v2 = vld [vmem:[#allocation4] sm:$0xff] }
 0x6d6   :  { %1588 = vmatmul.mubr.f32.vlgmr.msra.gmra.mxu0 %v918_v2 }
 0x6d7   :  { %v992_v7 = vld [vmem:[#allocation4 + $0x8] sm:$0xff] }
 0x6d8   :  { %1623 = vmatmul.mubr.f32.vlgmr.msra.gmra.mxu1 %v992_v7 }
 0x6d9   :  { %1673 = shalt.err (!%p1670_p4)
}
 0x6da   :  { %s1687_s12 = smov 128   ;;  %s1688_s13 = smov 8   ;;  %vm989_vm4 = vcmask 23552  }
 0x6db   :  { %1076 = dma.vmem_to_hbm [thread:$0]  %s1071_s0, 256, %s2200_s5, [#allocation5], %s1687_s12, %s1687_s12, %s1688_s13  }
 0x796   :  { %v985_v21 = vpop.f32.mrf.mxu0 }
 0x797   :  { %990 = vst.msk [vmem:[%s2201_s6] sm:$0xff] %vm989_vm4, %v985_v21 }
 0x798   :  { %v1589_v22 = vpop.f32.mrf.mxu0  ;;  %v1059_v23 = vpop.f32.mrf.mxu1 }
 0x799   :  { %1090 = vst.msk [vmem:[%s2201_s6 + $0x8] sm:$0xff] %vm989_vm4, %v1059_v23 }
 0x79a   :  { %v1624_v24 = vpop.f32.mrf.mxu1 }
 0x79b   :  { %1682 = dma.done.wait [#allocation5], 256  }
 0x79c   :  { %1683 = vsyncadd [#allocation5], 4294967040 }
 0x79d   :  { %1084 = vsyncpa [#allocation5], 1 }

</bundles_post_ra>
